<compile_context>
chip_gen: v5e
topology: v5e:2x2
jax: 0.10.0
libtpu: 0.0.40
codegen_flags: <defaults>
</compile_context>

<pallas_src>
import functools

import jax
import jax.numpy as jnp
from jax.experimental import pallas as pl
from jax.experimental.pallas import tpu as pltpu


def _lstm_kernel(x_ref, w_x_ref, w_h_ref, b_g_ref, w_out_ref, b_out_ref,
                 out_ref, h_scratch, *, mxu_dtype):
    """One batch tile over the FULL sequence (time loop lives in-kernel)."""
    T, nb, n_in = x_ref.shape          # time-major (T, b_blk, n_input) tile
    H = w_h_ref.shape[0]               # n_hidden

    # Grid-constant weights, hoisted out of the unrolled time loop.
    w_h = w_h_ref[...].astype(mxu_dtype)       # (H, 4H)
    w_out = w_out_ref[...].astype(mxu_dtype)   # (H, H)
    b_g = b_g_ref[...]                         # (1, 4H) f32
    b_out = b_out_ref[...]                     # (1, H)  f32

    # Hoisted, fused x-projection for ALL timesteps: one (T*nb, n_in) @ (n_in, 4H)
    # MXU matmul (gate bias folded in).  Time-major layout -> each serial step
    # below reads a contiguous (nb, 4H) slab instead of a strided mid-axis slice.
    x_all = x_ref[...].reshape(T * nb, n_in).astype(mxu_dtype)
    xproj = jnp.dot(x_all, w_x_ref[...].astype(mxu_dtype),
                    preferred_element_type=jnp.float32) + b_g
    xproj = xproj.reshape(T, nb, 4 * H)

    h = jnp.zeros((nb, H), jnp.float32)
    c = jnp.zeros((nb, H), jnp.float32)

    # Serial recurrence: ONLY gate math + the h_t stash live here; the output
    # projection / bias / relu / out_ref store are hoisted below the loop.
    # T is small and static -> full unroll gives the LLO scheduler visibility.
    # TODO(synk): for long sequences switch to lax.fori_loop(unroll=4..8) and
    # chunk the xproj computation along T to bound vreg/VMEM pressure.
    for t in range(T):
        z = xproj[t] + jnp.dot(h.astype(mxu_dtype), w_h,
                               preferred_element_type=jnp.float32)
        gates = jax.nn.sigmoid(z)      # every gate (incl. cell gate) is sigmoid
        f_g = gates[:, 0 * H:1 * H]
        i_g = gates[:, 1 * H:2 * H]
        g_g = gates[:, 2 * H:3 * H]
        o_g = gates[:, 3 * H:4 * H]

        c = c * f_g + i_g * g_g
        h = o_g * jnp.tanh(c)

        # Stash h_t (batch-major scratch so the final store needs no transpose).
        h_scratch[:, pl.ds(t, 1), :] = h.reshape(nb, 1, H)

    # Hoisted output head: ONE (nb*T, H) @ (H, H) matmul + bias + relu and a
    # single block store (no per-timestep stores / matmuls on the critical path).
    hs = h_scratch[...].reshape(nb * T, H)
    out_all = jnp.dot(hs.astype(mxu_dtype), w_out,
                      preferred_element_type=jnp.float32) + b_out
    out_all = jnp.maximum(out_all, 0.0)                      # relu
    out_ref[...] = out_all.reshape(nb, T, H)


@functools.partial(jax.jit, static_argnames=("b_blk", "mxu_dtype"))
def lstm_forward(x, w_x, w_h, b_g, w_out, b_out, *, b_blk=None,
                 mxu_dtype=jnp.float32):
    """x: (B, T, n_input) float32 -> (B, T, n_hidden) float32.

    b_blk: batch tile size.  Default None -> B (one big tile: best on the
      single-TensorCore v5e/v6e).  On v7x use b_blk = B // 2 so both
      TensorCores get a tile via the "parallel" grid axis.
    mxu_dtype: operand dtype for the matmuls (accumulation stays f32 and the
      gate elementwise math stays f32).  Use jnp.bfloat16 on v6e/v7x.
    """
    B, T, n_in = x.shape
    H = w_h.shape[0]
    if b_blk is None:
        b_blk = B
    assert B % b_blk == 0, "batch tile size must divide the batch"
    assert b_blk == B or b_blk % 8 == 0, (
        "b_blk must equal B or be a multiple of 8 (sublane tiling)")

    # Time-major input so the in-kernel x-projection / per-step reads are
    # contiguous; this transpose is cheap wrapper-side layout plumbing.
    x_tm = jnp.transpose(x, (1, 0, 2))                       # (T, B, n_in)

    grid_spec = pltpu.PrefetchScalarGridSpec(
        num_scalar_prefetch=0,
        grid=(B // b_blk,),                                   # batch tiles
        in_specs=[
            pl.BlockSpec((T, b_blk, n_in), lambda i: (0, i, 0)),  # x (time-major)
            pl.BlockSpec((n_in, 4 * H), lambda i: (0, 0)),        # W_x
            pl.BlockSpec((H, 4 * H), lambda i: (0, 0)),           # W_h
            pl.BlockSpec((1, 4 * H), lambda i: (0, 0)),           # gate bias
            pl.BlockSpec((H, H), lambda i: (0, 0)),               # W_out
            pl.BlockSpec((1, H), lambda i: (0, 0)),               # out bias
        ],
        out_specs=pl.BlockSpec((b_blk, T, H), lambda i: (i, 0, 0)),
        scratch_shapes=[pltpu.VMEM((b_blk, T, H), jnp.float32)],  # h_t stash
    )

    kernel = functools.partial(_lstm_kernel, mxu_dtype=mxu_dtype)
    return pl.pallas_call(
        kernel,
        out_shape=jax.ShapeDtypeStruct((B, T, H), jnp.float32),
        grid_spec=grid_spec,
        compiler_params=pltpu.CompilerParams(
            dimension_semantics=("parallel",),   # batch tiles are independent
            vmem_limit_bytes=32 * 1024 * 1024,   # above v5e's 16 MiB scoped default
        ),
    )(x_tm, w_x, w_h, b_g, w_out, b_out)


def init_params(key, n_input, n_hidden):
    """nn.Linear-style uniform init, stored pre-fused / pre-transposed.

    Gate columns are [forget | input | cell | output]; the fused gate weight's
    rows follow torch.cat([h, x]), split here as W_h (h rows) and W_x (x rows).
    """
    D = n_input + n_hidden
    k = jax.random.split(key, 5)
    bg = 1.0 / jnp.sqrt(jnp.float32(D))
    bo = 1.0 / jnp.sqrt(jnp.float32(n_hidden))
    w_h = jax.random.uniform(k[0], (n_hidden, 4 * n_hidden), jnp.float32, -bg, bg)
    w_x = jax.random.uniform(k[1], (n_input, 4 * n_hidden), jnp.float32, -bg, bg)
    b_g = jax.random.uniform(k[2], (1, 4 * n_hidden), jnp.float32, -bg, bg)
    w_out = jax.random.uniform(k[3], (n_hidden, n_hidden), jnp.float32, -bo, bo)
    b_out = jax.random.uniform(k[4], (1, n_hidden), jnp.float32, -bo, bo)
    return w_x, w_h, b_g, w_out, b_out


def lstm_reference(x, w_x, w_h, b_g, w_out, b_out):
    """Pure-JAX mirror of the PyTorch forward (concat + 4 sigmoid gates)."""
    B, T, _ = x.shape
    H = w_h.shape[0]
    w_gates = jnp.concatenate([w_h, w_x], axis=0)   # rows follow cat([h, x])
    h = jnp.zeros((B, H), jnp.float32)
    c = jnp.zeros((B, H), jnp.float32)
    outs = []
    for t in range(T):
        hx = jnp.concatenate([h, x[:, t, :]], axis=1)
        z = hx @ w_gates + b_g
        f = jax.nn.sigmoid(z[:, 0 * H:1 * H])
        i = jax.nn.sigmoid(z[:, 1 * H:2 * H])
        g = jax.nn.sigmoid(z[:, 2 * H:3 * H])
        o = jax.nn.sigmoid(z[:, 3 * H:4 * H])
        c = c * f + i * g
        h = o * jnp.tanh(c)
        outs.append(jnp.maximum(h @ w_out + b_out, 0.0))
    return jnp.stack(outs, axis=1)


if __name__ == "__main__":
    n_input, n_hidden = 16, 32
    B, T = 2, 8

    key = jax.random.PRNGKey(0)
    k_x, k_p = jax.random.split(key)
    x = jax.random.normal(k_x, (B, T, n_input), jnp.float32)
    w_x, w_h, b_g, w_out, b_out = init_params(k_p, n_input, n_hidden)

    # b_blk defaults to B (single big tile: right choice for v5e/v6e; on v7x
    # pass b_blk=B//2 when B allows so both TensorCores get work).
    out = lstm_forward(x, w_x, w_h, b_g, w_out, b_out)
    out = jax.block_until_ready(out)

    ref = lstm_reference(x, w_x, w_h, b_g, w_out, b_out)
    assert out.shape == (B, T, n_hidden)
    max_err = float(jnp.max(jnp.abs(out - ref)))
    assert jnp.allclose(out, ref, atol=1e-4, rtol=1e-4), (
        f"mismatch vs reference, max abs err = {max_err}")

    print("KERNEL_OK")
</pallas_src>

<mosaic_0001>
module attributes {stable_mosaic.version = 11 : i64} {
  func.func @_lstm_kernel(%arg0: i32, %arg1: memref<8x2x16xf32, #tpu.memory_space<vmem>>, %arg2: memref<16x128xf32, #tpu.memory_space<vmem>>, %arg3: memref<32x128xf32, #tpu.memory_space<vmem>>, %arg4: memref<1x128xf32, #tpu.memory_space<vmem>>, %arg5: memref<32x32xf32, #tpu.memory_space<vmem>>, %arg6: memref<1x32xf32, #tpu.memory_space<vmem>>, %arg7: memref<2x8x32xf32, #tpu.memory_space<vmem>>, %arg8: memref<2x8x32xf32, #tpu.memory_space<vmem>>) attributes {dimension_semantics = [#tpu.dimension_semantics<parallel>], iteration_bounds = array<i64: 1>, scalar_prefetch = 0 : i64, scratch_operands = 1 : i64, tpu.core_type = #tpu.core_type<tc>, window_params = [{transform_indices = @transform_0, window_bounds = array<i64: 8, 2, 16>}, {pipeline_mode = #tpu.pipeline_mode<synchronous>, transform_indices = @transform_1, window_bounds = array<i64: 16, 128>}, {pipeline_mode = #tpu.pipeline_mode<synchronous>, transform_indices = @transform_2, window_bounds = array<i64: 32, 128>}, {pipeline_mode = #tpu.pipeline_mode<synchronous>, transform_indices = @transform_3, window_bounds = array<i64: 1, 128>}, {pipeline_mode = #tpu.pipeline_mode<synchronous>, transform_indices = @transform_4, window_bounds = array<i64: 32, 32>}, {pipeline_mode = #tpu.pipeline_mode<synchronous>, transform_indices = @transform_5, window_bounds = array<i64: 1, 32>}, {transform_indices = @transform_6, window_bounds = array<i64: 2, 8, 32>}]} {
    %c0 = arith.constant 0 : index
    %c0_0 = arith.constant 0 : index
    %0 = vector.load %arg3[%c0, %c0_0] : memref<32x128xf32, #tpu.memory_space<vmem>>, vector<32x128xf32>
    %c0_1 = arith.constant 0 : index
    %c0_2 = arith.constant 0 : index
    %1 = vector.load %arg5[%c0_1, %c0_2] : memref<32x32xf32, #tpu.memory_space<vmem>>, vector<32x32xf32>
    %c0_3 = arith.constant 0 : index
    %c0_4 = arith.constant 0 : index
    %2 = vector.load %arg4[%c0_3, %c0_4] : memref<1x128xf32, #tpu.memory_space<vmem>>, vector<1x128xf32>
    %c0_5 = arith.constant 0 : index
    %c0_6 = arith.constant 0 : index
    %3 = vector.load %arg6[%c0_5, %c0_6] : memref<1x32xf32, #tpu.memory_space<vmem>>, vector<1x32xf32>
    %c0_7 = arith.constant 0 : index
    %c0_8 = arith.constant 0 : index
    %c0_9 = arith.constant 0 : index
    %4 = vector.load %arg1[%c0_7, %c0_8, %c0_9] : memref<8x2x16xf32, #tpu.memory_space<vmem>>, vector<8x2x16xf32>
    %5 = vector.shape_cast %4 : vector<8x2x16xf32> to vector<16x16xf32>
    %c0_10 = arith.constant 0 : index
    %c0_11 = arith.constant 0 : index
    %6 = vector.load %arg2[%c0_10, %c0_11] : memref<16x128xf32, #tpu.memory_space<vmem>>, vector<16x128xf32>
    %cst = arith.constant dense<0.000000e+00> : vector<16x128xf32>
    %7 = tpu.matmul %5, %6, %cst {dimension_numbers = #tpu.dot_dimension_numbers<[1], [0], [0], [1], [0, 0, 1, 1], [], []>} : vector<16x16xf32>, vector<16x128xf32>, vector<16x128xf32> -> vector<16x128xf32>
    %8 = vector.broadcast %2 : vector<1x128xf32> to vector<16x128xf32>
    %9 = arith.addf %7, %8 : vector<16x128xf32>
    %10 = vector.shape_cast %9 : vector<16x128xf32> to vector<8x2x128xf32>
    %cst_12 = arith.constant 0.000000e+00 : f32
    %11 = vector.broadcast %cst_12 : f32 to vector<2x32xf32>
    %cst_13 = arith.constant 0.000000e+00 : f32
    %12 = vector.broadcast %cst_13 : f32 to vector<2x32xf32>
    %13 = vector.extract_strided_slice %10 {offsets = [0, 0, 0], sizes = [1, 2, 128], strides = [1, 1, 1]} : vector<8x2x128xf32> to vector<1x2x128xf32>
    %14 = vector.shape_cast %13 : vector<1x2x128xf32> to vector<2x128xf32>
    %cst_14 = arith.constant dense<0.000000e+00> : vector<2x128xf32>
    %15 = tpu.matmul %11, %0, %cst_14 {dimension_numbers = #tpu.dot_dimension_numbers<[1], [0], [0], [1], [0, 0, 1, 1], [], []>} : vector<2x32xf32>, vector<32x128xf32>, vector<2x128xf32> -> vector<2x128xf32>
    %16 = arith.addf %14, %15 : vector<2x128xf32>
    %17 = arith.negf %16 : vector<2x128xf32>
    %18 = math.exp %17 : vector<2x128xf32>
    %cst_15 = arith.constant 1.000000e+00 : f32
    %19 = vector.broadcast %cst_15 : f32 to vector<2x128xf32>
    %20 = arith.addf %19, %18 : vector<2x128xf32>
    %21 = arith.divf %19, %20 : vector<2x128xf32>
    %22 = vector.extract_strided_slice %21 {offsets = [0, 0], sizes = [2, 32], strides = [1, 1]} : vector<2x128xf32> to vector<2x32xf32>
    %23 = vector.extract_strided_slice %21 {offsets = [0, 32], sizes = [2, 32], strides = [1, 1]} : vector<2x128xf32> to vector<2x32xf32>
    %24 = vector.extract_strided_slice %21 {offsets = [0, 64], sizes = [2, 32], strides = [1, 1]} : vector<2x128xf32> to vector<2x32xf32>
    %25 = vector.extract_strided_slice %21 {offsets = [0, 96], sizes = [2, 32], strides = [1, 1]} : vector<2x128xf32> to vector<2x32xf32>
    %26 = arith.mulf %12, %22 : vector<2x32xf32>
    %27 = arith.mulf %23, %24 : vector<2x32xf32>
    %28 = arith.addf %26, %27 : vector<2x32xf32>
    %29 = math.tanh %28 : vector<2x32xf32>
    %30 = arith.mulf %25, %29 : vector<2x32xf32>
    %31 = vector.shape_cast %30 : vector<2x32xf32> to vector<2x1x32xf32>
    %c0_16 = arith.constant 0 : index
    %c0_17 = arith.constant 0 : index
    %c0_18 = arith.constant 0 : index
    %32 = vector.load %arg8[%c0_16, %c0_17, %c0_18] : memref<2x8x32xf32, #tpu.memory_space<vmem>>, vector<2x1x32xf32>
    tpu.vector_store %arg8[%c0_16, %c0_17, %c0_18], %31 {strides = array<i32>} : memref<2x8x32xf32, #tpu.memory_space<vmem>>, vector<2x1x32xf32>,
    %33 = vector.extract_strided_slice %10 {offsets = [1, 0, 0], sizes = [1, 2, 128], strides = [1, 1, 1]} : vector<8x2x128xf32> to vector<1x2x128xf32>
    %34 = vector.shape_cast %33 : vector<1x2x128xf32> to vector<2x128xf32>
    %cst_19 = arith.constant dense<0.000000e+00> : vector<2x128xf32>
    %35 = tpu.matmul %30, %0, %cst_19 {dimension_numbers = #tpu.dot_dimension_numbers<[1], [0], [0], [1], [0, 0, 1, 1], [], []>} : vector<2x32xf32>, vector<32x128xf32>, vector<2x128xf32> -> vector<2x128xf32>
    %36 = arith.addf %34, %35 : vector<2x128xf32>
    %37 = arith.negf %36 : vector<2x128xf32>
    %38 = math.exp %37 : vector<2x128xf32>
    %cst_20 = arith.constant 1.000000e+00 : f32
    %39 = vector.broadcast %cst_20 : f32 to vector<2x128xf32>
    %40 = arith.addf %39, %38 : vector<2x128xf32>
    %41 = arith.divf %39, %40 : vector<2x128xf32>
    %42 = vector.extract_strided_slice %41 {offsets = [0, 0], sizes = [2, 32], strides = [1, 1]} : vector<2x128xf32> to vector<2x32xf32>
    %43 = vector.extract_strided_slice %41 {offsets = [0, 32], sizes = [2, 32], strides = [1, 1]} : vector<2x128xf32> to vector<2x32xf32>
    %44 = vector.extract_strided_slice %41 {offsets = [0, 64], sizes = [2, 32], strides = [1, 1]} : vector<2x128xf32> to vector<2x32xf32>
    %45 = vector.extract_strided_slice %41 {offsets = [0, 96], sizes = [2, 32], strides = [1, 1]} : vector<2x128xf32> to vector<2x32xf32>
    %46 = arith.mulf %28, %42 : vector<2x32xf32>
    %47 = arith.mulf %43, %44 : vector<2x32xf32>
    %48 = arith.addf %46, %47 : vector<2x32xf32>
    %49 = math.tanh %48 : vector<2x32xf32>
    %50 = arith.mulf %45, %49 : vector<2x32xf32>
    %51 = vector.shape_cast %50 : vector<2x32xf32> to vector<2x1x32xf32>
    %c0_21 = arith.constant 0 : index
    %c1 = arith.constant 1 : index
    %c0_22 = arith.constant 0 : index
    %52 = vector.load %arg8[%c0_21, %c1, %c0_22] : memref<2x8x32xf32, #tpu.memory_space<vmem>>, vector<2x1x32xf32>
    tpu.vector_store %arg8[%c0_21, %c1, %c0_22], %51 {strides = array<i32>} : memref<2x8x32xf32, #tpu.memory_space<vmem>>, vector<2x1x32xf32>,
    %53 = vector.extract_strided_slice %10 {offsets = [2, 0, 0], sizes = [1, 2, 128], strides = [1, 1, 1]} : vector<8x2x128xf32> to vector<1x2x128xf32>
    %54 = vector.shape_cast %53 : vector<1x2x128xf32> to vector<2x128xf32>
    %cst_23 = arith.constant dense<0.000000e+00> : vector<2x128xf32>
    %55 = tpu.matmul %50, %0, %cst_23 {dimension_numbers = #tpu.dot_dimension_numbers<[1], [0], [0], [1], [0, 0, 1, 1], [], []>} : vector<2x32xf32>, vector<32x128xf32>, vector<2x128xf32> -> vector<2x128xf32>
    %56 = arith.addf %54, %55 : vector<2x128xf32>
    %57 = arith.negf %56 : vector<2x128xf32>
    %58 = math.exp %57 : vector<2x128xf32>
    %cst_24 = arith.constant 1.000000e+00 : f32
    %59 = vector.broadcast %cst_24 : f32 to vector<2x128xf32>
    %60 = arith.addf %59, %58 : vector<2x128xf32>
    %61 = arith.divf %59, %60 : vector<2x128xf32>
    %62 = vector.extract_strided_slice %61 {offsets = [0, 0], sizes = [2, 32], strides = [1, 1]} : vector<2x128xf32> to vector<2x32xf32>
    %63 = vector.extract_strided_slice %61 {offsets = [0, 32], sizes = [2, 32], strides = [1, 1]} : vector<2x128xf32> to vector<2x32xf32>
    %64 = vector.extract_strided_slice %61 {offsets = [0, 64], sizes = [2, 32], strides = [1, 1]} : vector<2x128xf32> to vector<2x32xf32>
    %65 = vector.extract_strided_slice %61 {offsets = [0, 96], sizes = [2, 32], strides = [1, 1]} : vector<2x128xf32> to vector<2x32xf32>
    %66 = arith.mulf %48, %62 : vector<2x32xf32>
    %67 = arith.mulf %63, %64 : vector<2x32xf32>
    %68 = arith.addf %66, %67 : vector<2x32xf32>
    %69 = math.tanh %68 : vector<2x32xf32>
    %70 = arith.mulf %65, %69 : vector<2x32xf32>
    %71 = vector.shape_cast %70 : vector<2x32xf32> to vector<2x1x32xf32>
    %c0_25 = arith.constant 0 : index
    %c2 = arith.constant 2 : index
    %c0_26 = arith.constant 0 : index
    %72 = vector.load %arg8[%c0_25, %c2, %c0_26] : memref<2x8x32xf32, #tpu.memory_space<vmem>>, vector<2x1x32xf32>
    tpu.vector_store %arg8[%c0_25, %c2, %c0_26], %71 {strides = array<i32>} : memref<2x8x32xf32, #tpu.memory_space<vmem>>, vector<2x1x32xf32>,
    %73 = vector.extract_strided_slice %10 {offsets = [3, 0, 0], sizes = [1, 2, 128], strides = [1, 1, 1]} : vector<8x2x128xf32> to vector<1x2x128xf32>
    %74 = vector.shape_cast %73 : vector<1x2x128xf32> to vector<2x128xf32>
    %cst_27 = arith.constant dense<0.000000e+00> : vector<2x128xf32>
    %75 = tpu.matmul %70, %0, %cst_27 {dimension_numbers = #tpu.dot_dimension_numbers<[1], [0], [0], [1], [0, 0, 1, 1], [], []>} : vector<2x32xf32>, vector<32x128xf32>, vector<2x128xf32> -> vector<2x128xf32>
    %76 = arith.addf %74, %75 : vector<2x128xf32>
    %77 = arith.negf %76 : vector<2x128xf32>
    %78 = math.exp %77 : vector<2x128xf32>
    %cst_28 = arith.constant 1.000000e+00 : f32
    %79 = vector.broadcast %cst_28 : f32 to vector<2x128xf32>
    %80 = arith.addf %79, %78 : vector<2x128xf32>
    %81 = arith.divf %79, %80 : vector<2x128xf32>
    %82 = vector.extract_strided_slice %81 {offsets = [0, 0], sizes = [2, 32], strides = [1, 1]} : vector<2x128xf32> to vector<2x32xf32>
    %83 = vector.extract_strided_slice %81 {offsets = [0, 32], sizes = [2, 32], strides = [1, 1]} : vector<2x128xf32> to vector<2x32xf32>
    %84 = vector.extract_strided_slice %81 {offsets = [0, 64], sizes = [2, 32], strides = [1, 1]} : vector<2x128xf32> to vector<2x32xf32>
    %85 = vector.extract_strided_slice %81 {offsets = [0, 96], sizes = [2, 32], strides = [1, 1]} : vector<2x128xf32> to vector<2x32xf32>
    %86 = arith.mulf %68, %82 : vector<2x32xf32>
    %87 = arith.mulf %83, %84 : vector<2x32xf32>
    %88 = arith.addf %86, %87 : vector<2x32xf32>
    %89 = math.tanh %88 : vector<2x32xf32>
    %90 = arith.mulf %85, %89 : vector<2x32xf32>
    %91 = vector.shape_cast %90 : vector<2x32xf32> to vector<2x1x32xf32>
    %c0_29 = arith.constant 0 : index
    %c3 = arith.constant 3 : index
    %c0_30 = arith.constant 0 : index
    %92 = vector.load %arg8[%c0_29, %c3, %c0_30] : memref<2x8x32xf32, #tpu.memory_space<vmem>>, vector<2x1x32xf32>
    tpu.vector_store %arg8[%c0_29, %c3, %c0_30], %91 {strides = array<i32>} : memref<2x8x32xf32, #tpu.memory_space<vmem>>, vector<2x1x32xf32>,
    %93 = vector.extract_strided_slice %10 {offsets = [4, 0, 0], sizes = [1, 2, 128], strides = [1, 1, 1]} : vector<8x2x128xf32> to vector<1x2x128xf32>
    %94 = vector.shape_cast %93 : vector<1x2x128xf32> to vector<2x128xf32>
    %cst_31 = arith.constant dense<0.000000e+00> : vector<2x128xf32>
    %95 = tpu.matmul %90, %0, %cst_31 {dimension_numbers = #tpu.dot_dimension_numbers<[1], [0], [0], [1], [0, 0, 1, 1], [], []>} : vector<2x32xf32>, vector<32x128xf32>, vector<2x128xf32> -> vector<2x128xf32>
    %96 = arith.addf %94, %95 : vector<2x128xf32>
    %97 = arith.negf %96 : vector<2x128xf32>
    %98 = math.exp %97 : vector<2x128xf32>
    %cst_32 = arith.constant 1.000000e+00 : f32
    %99 = vector.broadcast %cst_32 : f32 to vector<2x128xf32>
    %100 = arith.addf %99, %98 : vector<2x128xf32>
    %101 = arith.divf %99, %100 : vector<2x128xf32>
    %102 = vector.extract_strided_slice %101 {offsets = [0, 0], sizes = [2, 32], strides = [1, 1]} : vector<2x128xf32> to vector<2x32xf32>
    %103 = vector.extract_strided_slice %101 {offsets = [0, 32], sizes = [2, 32], strides = [1, 1]} : vector<2x128xf32> to vector<2x32xf32>
    %104 = vector.extract_strided_slice %101 {offsets = [0, 64], sizes = [2, 32], strides = [1, 1]} : vector<2x128xf32> to vector<2x32xf32>
    %105 = vector.extract_strided_slice %101 {offsets = [0, 96], sizes = [2, 32], strides = [1, 1]} : vector<2x128xf32> to vector<2x32xf32>
    %106 = arith.mulf %88, %102 : vector<2x32xf32>
    %107 = arith.mulf %103, %104 : vector<2x32xf32>
    %108 = arith.addf %106, %107 : vector<2x32xf32>
    %109 = math.tanh %108 : vector<2x32xf32>
    %110 = arith.mulf %105, %109 : vector<2x32xf32>
    %111 = vector.shape_cast %110 : vector<2x32xf32> to vector<2x1x32xf32>
    %c0_33 = arith.constant 0 : index
    %c4 = arith.constant 4 : index
    %c0_34 = arith.constant 0 : index
    %112 = vector.load %arg8[%c0_33, %c4, %c0_34] : memref<2x8x32xf32, #tpu.memory_space<vmem>>, vector<2x1x32xf32>
    tpu.vector_store %arg8[%c0_33, %c4, %c0_34], %111 {strides = array<i32>} : memref<2x8x32xf32, #tpu.memory_space<vmem>>, vector<2x1x32xf32>,
    %113 = vector.extract_strided_slice %10 {offsets = [5, 0, 0], sizes = [1, 2, 128], strides = [1, 1, 1]} : vector<8x2x128xf32> to vector<1x2x128xf32>
    %114 = vector.shape_cast %113 : vector<1x2x128xf32> to vector<2x128xf32>
    %cst_35 = arith.constant dense<0.000000e+00> : vector<2x128xf32>
    %115 = tpu.matmul %110, %0, %cst_35 {dimension_numbers = #tpu.dot_dimension_numbers<[1], [0], [0], [1], [0, 0, 1, 1], [], []>} : vector<2x32xf32>, vector<32x128xf32>, vector<2x128xf32> -> vector<2x128xf32>
    %116 = arith.addf %114, %115 : vector<2x128xf32>
    %117 = arith.negf %116 : vector<2x128xf32>
    %118 = math.exp %117 : vector<2x128xf32>
    %cst_36 = arith.constant 1.000000e+00 : f32
    %119 = vector.broadcast %cst_36 : f32 to vector<2x128xf32>
    %120 = arith.addf %119, %118 : vector<2x128xf32>
    %121 = arith.divf %119, %120 : vector<2x128xf32>
    %122 = vector.extract_strided_slice %121 {offsets = [0, 0], sizes = [2, 32], strides = [1, 1]} : vector<2x128xf32> to vector<2x32xf32>
    %123 = vector.extract_strided_slice %121 {offsets = [0, 32], sizes = [2, 32], strides = [1, 1]} : vector<2x128xf32> to vector<2x32xf32>
    %124 = vector.extract_strided_slice %121 {offsets = [0, 64], sizes = [2, 32], strides = [1, 1]} : vector<2x128xf32> to vector<2x32xf32>
    %125 = vector.extract_strided_slice %121 {offsets = [0, 96], sizes = [2, 32], strides = [1, 1]} : vector<2x128xf32> to vector<2x32xf32>
    %126 = arith.mulf %108, %122 : vector<2x32xf32>
    %127 = arith.mulf %123, %124 : vector<2x32xf32>
    %128 = arith.addf %126, %127 : vector<2x32xf32>
    %129 = math.tanh %128 : vector<2x32xf32>
    %130 = arith.mulf %125, %129 : vector<2x32xf32>
    %131 = vector.shape_cast %130 : vector<2x32xf32> to vector<2x1x32xf32>
    %c0_37 = arith.constant 0 : index
    %c5 = arith.constant 5 : index
    %c0_38 = arith.constant 0 : index
    %132 = vector.load %arg8[%c0_37, %c5, %c0_38] : memref<2x8x32xf32, #tpu.memory_space<vmem>>, vector<2x1x32xf32>
    tpu.vector_store %arg8[%c0_37, %c5, %c0_38], %131 {strides = array<i32>} : memref<2x8x32xf32, #tpu.memory_space<vmem>>, vector<2x1x32xf32>,
    %133 = vector.extract_strided_slice %10 {offsets = [6, 0, 0], sizes = [1, 2, 128], strides = [1, 1, 1]} : vector<8x2x128xf32> to vector<1x2x128xf32>
    %134 = vector.shape_cast %133 : vector<1x2x128xf32> to vector<2x128xf32>
    %cst_39 = arith.constant dense<0.000000e+00> : vector<2x128xf32>
    %135 = tpu.matmul %130, %0, %cst_39 {dimension_numbers = #tpu.dot_dimension_numbers<[1], [0], [0], [1], [0, 0, 1, 1], [], []>} : vector<2x32xf32>, vector<32x128xf32>, vector<2x128xf32> -> vector<2x128xf32>
    %136 = arith.addf %134, %135 : vector<2x128xf32>
    %137 = arith.negf %136 : vector<2x128xf32>
    %138 = math.exp %137 : vector<2x128xf32>
    %cst_40 = arith.constant 1.000000e+00 : f32
    %139 = vector.broadcast %cst_40 : f32 to vector<2x128xf32>
    %140 = arith.addf %139, %138 : vector<2x128xf32>
    %141 = arith.divf %139, %140 : vector<2x128xf32>
    %142 = vector.extract_strided_slice %141 {offsets = [0, 0], sizes = [2, 32], strides = [1, 1]} : vector<2x128xf32> to vector<2x32xf32>
    %143 = vector.extract_strided_slice %141 {offsets = [0, 32], sizes = [2, 32], strides = [1, 1]} : vector<2x128xf32> to vector<2x32xf32>
    %144 = vector.extract_strided_slice %141 {offsets = [0, 64], sizes = [2, 32], strides = [1, 1]} : vector<2x128xf32> to vector<2x32xf32>
    %145 = vector.extract_strided_slice %141 {offsets = [0, 96], sizes = [2, 32], strides = [1, 1]} : vector<2x128xf32> to vector<2x32xf32>
    %146 = arith.mulf %128, %142 : vector<2x32xf32>
    %147 = arith.mulf %143, %144 : vector<2x32xf32>
    %148 = arith.addf %146, %147 : vector<2x32xf32>
    %149 = math.tanh %148 : vector<2x32xf32>
    %150 = arith.mulf %145, %149 : vector<2x32xf32>
    %151 = vector.shape_cast %150 : vector<2x32xf32> to vector<2x1x32xf32>
    %c0_41 = arith.constant 0 : index
    %c6 = arith.constant 6 : index
    %c0_42 = arith.constant 0 : index
    %152 = vector.load %arg8[%c0_41, %c6, %c0_42] : memref<2x8x32xf32, #tpu.memory_space<vmem>>, vector<2x1x32xf32>
    tpu.vector_store %arg8[%c0_41, %c6, %c0_42], %151 {strides = array<i32>} : memref<2x8x32xf32, #tpu.memory_space<vmem>>, vector<2x1x32xf32>,
    %153 = vector.extract_strided_slice %10 {offsets = [7, 0, 0], sizes = [1, 2, 128], strides = [1, 1, 1]} : vector<8x2x128xf32> to vector<1x2x128xf32>
    %154 = vector.shape_cast %153 : vector<1x2x128xf32> to vector<2x128xf32>
    %cst_43 = arith.constant dense<0.000000e+00> : vector<2x128xf32>
    %155 = tpu.matmul %150, %0, %cst_43 {dimension_numbers = #tpu.dot_dimension_numbers<[1], [0], [0], [1], [0, 0, 1, 1], [], []>} : vector<2x32xf32>, vector<32x128xf32>, vector<2x128xf32> -> vector<2x128xf32>
    %156 = arith.addf %154, %155 : vector<2x128xf32>
    %157 = arith.negf %156 : vector<2x128xf32>
    %158 = math.exp %157 : vector<2x128xf32>
    %cst_44 = arith.constant 1.000000e+00 : f32
    %159 = vector.broadcast %cst_44 : f32 to vector<2x128xf32>
    %160 = arith.addf %159, %158 : vector<2x128xf32>
    %161 = arith.divf %159, %160 : vector<2x128xf32>
    %162 = vector.extract_strided_slice %161 {offsets = [0, 0], sizes = [2, 32], strides = [1, 1]} : vector<2x128xf32> to vector<2x32xf32>
    %163 = vector.extract_strided_slice %161 {offsets = [0, 32], sizes = [2, 32], strides = [1, 1]} : vector<2x128xf32> to vector<2x32xf32>
    %164 = vector.extract_strided_slice %161 {offsets = [0, 64], sizes = [2, 32], strides = [1, 1]} : vector<2x128xf32> to vector<2x32xf32>
    %165 = vector.extract_strided_slice %161 {offsets = [0, 96], sizes = [2, 32], strides = [1, 1]} : vector<2x128xf32> to vector<2x32xf32>
    %166 = arith.mulf %148, %162 : vector<2x32xf32>
    %167 = arith.mulf %163, %164 : vector<2x32xf32>
    %168 = arith.addf %166, %167 : vector<2x32xf32>
    %169 = math.tanh %168 : vector<2x32xf32>
    %170 = arith.mulf %165, %169 : vector<2x32xf32>
    %171 = vector.shape_cast %170 : vector<2x32xf32> to vector<2x1x32xf32>
    %c0_45 = arith.constant 0 : index
    %c7 = arith.constant 7 : index
    %c0_46 = arith.constant 0 : index
    %172 = vector.load %arg8[%c0_45, %c7, %c0_46] : memref<2x8x32xf32, #tpu.memory_space<vmem>>, vector<2x1x32xf32>
    tpu.vector_store %arg8[%c0_45, %c7, %c0_46], %171 {strides = array<i32>} : memref<2x8x32xf32, #tpu.memory_space<vmem>>, vector<2x1x32xf32>,
    %c0_47 = arith.constant 0 : index
    %c0_48 = arith.constant 0 : index
    %c0_49 = arith.constant 0 : index
    %173 = vector.load %arg8[%c0_47, %c0_48, %c0_49] : memref<2x8x32xf32, #tpu.memory_space<vmem>>, vector<2x8x32xf32>
    %174 = vector.shape_cast %173 : vector<2x8x32xf32> to vector<16x32xf32>
    %cst_50 = arith.constant dense<0.000000e+00> : vector<16x32xf32>
    %175 = tpu.matmul %174, %1, %cst_50 {dimension_numbers = #tpu.dot_dimension_numbers<[1], [0], [0], [1], [0, 0, 1, 1], [], []>} : vector<16x32xf32>, vector<32x32xf32>, vector<16x32xf32> -> vector<16x32xf32>
    %176 = vector.broadcast %3 : vector<1x32xf32> to vector<16x32xf32>
    %177 = arith.addf %175, %176 : vector<16x32xf32>
    %cst_51 = arith.constant 0.000000e+00 : f32
    %178 = vector.broadcast %cst_51 : f32 to vector<16x32xf32>
    %179 = arith.maximumf %177, %178 : vector<16x32xf32>
    %180 = vector.shape_cast %179 : vector<16x32xf32> to vector<2x8x32xf32>
    %c0_52 = arith.constant 0 : index
    %c0_53 = arith.constant 0 : index
    %c0_54 = arith.constant 0 : index
    %181 = vector.load %arg7[%c0_52, %c0_53, %c0_54] : memref<2x8x32xf32, #tpu.memory_space<vmem>>, vector<2x8x32xf32>
    tpu.vector_store %arg7[%c0_52, %c0_53, %c0_54], %180 {strides = array<i32>} : memref<2x8x32xf32, #tpu.memory_space<vmem>>, vector<2x8x32xf32>,
    return
  }
  func.func @transform_0(%arg0: i32) -> (i32, i32, i32) {
    %c0_i32 = arith.constant 0 : i32
    %c0_i32_0 = arith.constant 0 : i32
    %c0_i32_1 = arith.constant 0 : i32
    return %c0_i32, %arg0, %c0_i32_0 : i32, i32, i32
  }
  func.func @transform_1(%arg0: i32) -> (i32, i32) {
    %c0_i32 = arith.constant 0 : i32
    %c0_i32_0 = arith.constant 0 : i32
    %c0_i32_1 = arith.constant 0 : i32
    return %c0_i32, %c0_i32_0 : i32, i32
  }
  func.func @transform_2(%arg0: i32) -> (i32, i32) {
    %c0_i32 = arith.constant 0 : i32
    %c0_i32_0 = arith.constant 0 : i32
    %c0_i32_1 = arith.constant 0 : i32
    return %c0_i32, %c0_i32_0 : i32, i32
  }
  func.func @transform_3(%arg0: i32) -> (i32, i32) {
    %c0_i32 = arith.constant 0 : i32
    %c0_i32_0 = arith.constant 0 : i32
    %c0_i32_1 = arith.constant 0 : i32
    return %c0_i32, %c0_i32_0 : i32, i32
  }
  func.func @transform_4(%arg0: i32) -> (i32, i32) {
    %c0_i32 = arith.constant 0 : i32
    %c0_i32_0 = arith.constant 0 : i32
    %c0_i32_1 = arith.constant 0 : i32
    return %c0_i32, %c0_i32_0 : i32, i32
  }
  func.func @transform_5(%arg0: i32) -> (i32, i32) {
    %c0_i32 = arith.constant 0 : i32
    %c0_i32_0 = arith.constant 0 : i32
    %c0_i32_1 = arith.constant 0 : i32
    return %c0_i32, %c0_i32_0 : i32, i32
  }
  func.func @transform_6(%arg0: i32) -> (i32, i32, i32) {
    %c0_i32 = arith.constant 0 : i32
    %c0_i32_0 = arith.constant 0 : i32
    %c0_i32_1 = arith.constant 0 : i32
    return %arg0, %c0_i32, %c0_i32_0 : i32, i32, i32
  }
}

</mosaic_0001>

<bundles_post_ra>
// kernel: lstm_forward.1
= control target key start
LH: loop header
LB: loop body
LE: loop exit
PB: predicated region body
PF: predicated region fallthrough
CT: control target
= control target key end

     0   :  { %11 = vsyncpa [#allocation4], 0  ;;  %s1470_s0 = inlined_call_operand.vmem [shape: f32[8,2,16], index: 0, kind: input, shape index: {}]   ;;  %s1471_s1 = inlined_call_operand.hbm [shape: f32[16,128], index: 1, kind: input, shape index: {}]   ;;  %s1472_s2 = inlined_call_operand.vmem [shape: f32[32,128], index: 2, kind: input, shape index: {}]   ;;  %s1473_s3 = inlined_call_operand.vmem [shape: f32[1,128], index: 3, kind: input, shape index: {}]   ;;  %s1474_s4 = inlined_call_operand.hbm [shape: f32[32,32], index: 4, kind: input, shape index: {}]   ;;  %s1475_s5 = inlined_call_operand.vmem [shape: f32[1,32], index: 5, kind: input, shape index: {}]   ;;  %s1476_s6 = inlined_call_operand.hbm [shape: f32[2,8,32], index: 6, kind: output, shape index: {}]  }
   0x1   :  { %12 = vsyncpa [#allocation7], 0 }
   0x2   :  { %13 = vsyncpa [#allocation5], 0  ;;  %s20_s23 = sshll.u32 %s1471_s1, 4  ;;  %s1036_s24 = smov [#allocation3]   ;;  %s21_s23 = int_to_ptr.hbm [resolvable:$true] %s20_s23 }
   0x3   :  { %s22_s25 = sshll.u32 %s1036_s24, 4  ;;  %s37_s28 = sshll.u32 %s1474_s4, 4  ;;  %s23_s25 = int_to_ptr.vmem [resolvable:$true] %s22_s25  ;;  %s38_s28 = int_to_ptr.hbm [resolvable:$true] %s37_s28 }
   0x4   :  { %s1037_s29 = smov 128   ;;  %s1038_s30 = smov 8  }
   0x5   :  { %28 = dma.hbm_to_vmem [thread:$0]  %s21_s23, 256, %s23_s25, [#allocation4], %s1037_s29, %s1037_s29, %s1038_s30  }
   0x6   :  { %s1039_s7 = smov [#allocation6]  }
   0x7   :  { %s39_s8 = sshll.u32 %s1039_s7, 4  ;;  %s40_s8 = int_to_ptr.vmem [resolvable:$true] %s39_s8 }
   0x8   :  { %45 = dma.hbm_to_vmem [thread:$0]  %s38_s28, 512, %s40_s8, [#allocation7], %s1037_s29, %s1037_s29, %s1038_s30  }
   0x9   :  { %1030 = dma.done.wait [#allocation4], 256  }
   0xa   :  { %1031 = vsyncadd [#allocation4], 4294967040 }
   0xb   :  { %1032 = dma.done.wait [#allocation7], 512  }
   0xc   :  { %1033 = vsyncadd [#allocation7], 4294966784  ;;  %v1094_v0 = vld [vmem:[%s1472_s2 + $0x18] sm:$0xff]  ;;  %v75_v1 = vld [vmem:[#allocation3 + $0x8] sm:$0xff]  ;;  %v1040_v10 = vmov 0.0   ;;  %vm104_vm0 = vcmask 130048  }
   0xd   :  { %v1099_v2 = vld [vmem:[%s1472_s2 + $0x10] sm:$0xff]  ;;  %162 = vmatpush.msra.mxu1 %v1094_v0  ;;  %123 = vmatpush.msra.mxu0 %v75_v1  ;;  %v74_v3 = vld [vmem:[#allocation3] sm:$0xff]  ;;  %v66_v4 = vld [vmem:[%s1470_s0] sm:$0x3]  ;;  %vm217_vm5 = vcmask 1041409   ;;  %vm219_vm6 = vcmask 1043459  }
   0xe   :  { %v1108_v5 = vld [vmem:[%s1472_s2 + $0x8] sm:$0xff]  ;;  %v67_v6 = vld [vmem:[%s1470_s0 + $0x2] sm:$0x3]  ;;  %v68_v7 = vld [vmem:[%s1470_s0 + $0x4] sm:$0x3]  ;;  %253 = vmatpush.msra.mxu3 %v1094_v0  ;;  %505 = vmatpush.msra.mxu2 %v1094_v0  ;;  %vm221_vm7 = vcmask 1042433  }
   0xf   :  { %163 = vmatpush.msra.mxu1 %v1099_v2  ;;  %124 = vmatpush.msra.mxu0 %v74_v3  ;;  %v69_v8 = vld [vmem:[%s1470_s0 + $0x6] sm:$0x3]  ;;  %87 = vst [vmem:[#allocation1] ss:$4 sm:$0xff] %v66_v4  ;;  %v1155_v12 = vld [vmem:[%s1473_s3] ss:$0 sm:$0xff] }
  0x10   :  { %89 = vst [vmem:[#allocation1 + $0x1] ss:$4 sm:$0xff] %v67_v6  ;;  %v1125_v9 = vld [vmem:[%s1472_s2] sm:$0xff]  ;;  %254 = vmatpush.msra.mxu3 %v1099_v2  ;;  %506 = vmatpush.msra.mxu2 %v1099_v2  ;;  %s1041_s3 = smov 96   ;;  %s1042_s24 = smov 32   ;;  %vm146_vm8 = vcmask 261120  }
  0x11   :  { %164 = vmatpush.msra.mxu1 %v1108_v5  ;;  %91 = vst [vmem:[#allocation1 + $0x2] ss:$4 sm:$0xff] %v68_v7  ;;  %673 = vmatpush.msrb.mxu0 %v1094_v0  ;;  %vm211_vm13 = vcmask 1040384   ;;  %vm213_vm14 = vcmask 1042434   ;;  %vm215_vm15 = vcmask 1041408   ;;  %s1043_s10 = smov [#allocation8]  }
  0x12   :  { %93 = vst [vmem:[#allocation1 + $0x3] ss:$4 sm:$0xff] %v69_v8  ;;  %255 = vmatpush.msra.mxu3 %v1108_v5  ;;  %507 = vmatpush.msra.mxu2 %v1108_v5  ;;  %s865_s11 = sshll.u32 %s1043_s10, 4  ;;  %s867_s14 = sshll.u32 %s1476_s6, 4  ;;  %s866_s11 = int_to_ptr.vmem [resolvable:$true] %s865_s11  ;;  %s868_s14 = int_to_ptr.hbm [resolvable:$true] %s867_s14 }
  0x13   :  { %165 = vmatpush.msra.mxu1 %v1125_v9  ;;  %674 = vmatpush.msrb.mxu0 %v1099_v2 }
  0x14   :  { %166 = vmatmul.f32.vlgmr.msra.gmra.mxu1 %v1040_v10  ;;  %256 = vmatpush.msra.mxu3 %v1125_v9 }
  0x15   :  { %421 = vmatpush.msrb.mxu1 %v1094_v0  ;;  %508 = vmatpush.msra.mxu2 %v1125_v9 }
  0x16   :  { %337 = vmatpush.msrb.mxu3 %v1094_v0  ;;  %675 = vmatpush.msrb.mxu0 %v1108_v5 }
  0x17   :  { %422 = vmatpush.msrb.mxu1 %v1099_v2 }
  0x18   :  { %338 = vmatpush.msrb.mxu3 %v1099_v2  ;;  %676 = vmatpush.msrb.mxu0 %v1125_v9 }
  0x19   :  { %v102_v11 = vld.sshfl [vmem:[#allocation1] sm:$0xff pattern:$0x73625140]  ;;  %423 = vmatpush.msrb.mxu1 %v1108_v5 }
  0x1a   :  { %339 = vmatpush.msrb.mxu3 %v1108_v5  ;;  %881 = vmatmul.msk.f32.vlgmr.msra.gmra.mxu0 %vm104_vm0, %v102_v11 }
  0x1b   :  { %424 = vmatpush.msrb.mxu1 %v1125_v9 }
  0x1c   :  { %340 = vmatpush.msrb.mxu3 %v1125_v9 }
  0x1d   :  { %757 = vmatpush.msra.mxu1 %v1094_v0 }
  0x1f   :  { %758 = vmatpush.msra.mxu1 %v1099_v2 }
  0x21   :  { %759 = vmatpush.msra.mxu1 %v1108_v5 }
  0x23   :  { %760 = vmatpush.msra.mxu1 %v1125_v9 }
  0x91   :  { %v167_v14 = vpop.f32.mrf.mxu1 }
  0x97   :  { %v126_v13 = vpop.f32.mrf.mxu0 }
  0x98   :  { %v1158_v15 = vadd.f32 %v1155_v12, %v126_v13 }
  0x9a   :  { %v170_v16 = vadd.f32 %v167_v14, %v1158_v15  ;;  %v134_v46 = vrot.slane %v1158_v15, 2 }
  0x9c   :  { %v883_v17 = vmul.f32 -1.442695, %v170_v16  ;;  %v135_v16 = vrot.slane %v1158_v15, 4 }
  0x9e   :  { %910 = vpow2.f32 %v883_v17 }
  0xa4   :  { %v911_v18 = vpop.eup %910 }
  0xa5   :  { %v174_v19 = vadd.f32 1.0, %v911_v18 }
  0xa7   :  { %912 = vrcp.f32 %v174_v19  ;;  %v186_v23 = vand.u32 2147483648, %v174_v19  ;;  %v184_v25 = vand.u32 2147483647, %v174_v19  ;;  %vm180_vm2 = vweird.f32 %v174_v19 }
  0xa9   :  { %v187_v27 = vor.u32 1.1754944e-38, %v186_v23  ;;  %vm185_vm4 = vcmp.eq.f32.partialorder %v184_v25, 8.507059e+37 }
  0xad   :  { %v913_v20 = vpop.eup %912 }
  0xae   :  { %v176_v21 = vmul.f32 %v913_v20, %v174_v19  ;;  %vm181_vm1 = vweird.f32 %v913_v20 }
  0xaf   :  { %vm182_vm3 = vmor %vm180_vm2, %vm181_vm1 }
  0xb0   :  { %v177_v22 = vsub.f32 1.0, %v176_v21 }
  0xb2   :  { %v178_v24 = vmul.f32 %v913_v20, %v177_v22 }
  0xb4   :  { %v179_v26 = vadd.f32 %v913_v20, %v178_v24 }
  0xb6   :  { %v183_v28 = vsel %vm182_vm3, %v913_v20, %v179_v26 }
  0xb7   :  { %v188_v29 = vsel %vm185_vm4, %v187_v27, %v183_v28 }
  0xb8   :  { %192 = vrot.lane.b32.xlu0 %v188_v29, %s1041_s3  ;;  %v190_v32 = vmul.f32 0.0, %v188_v29 }
 0x12a   :  { %v193_v30 = vpop.permute.xlu0 %192 }
 0x12b   :  { %v195_v31 = vmul.f32 %v193_v30, %v188_v29 }
 0x12d   :  { %197 = vrot.lane.b32.xlu0 %v195_v31, %s1041_s3 }
 0x19f   :  { %v198_v33 = vpop.permute.xlu0 %197 }
 0x1a0   :  { %v200_v34 = vadd.f32 %v198_v33, %v190_v32 }
 0x1a2   :  { %914 = vtanh.f32 %v200_v34 }
 0x1a8   :  { %v915_v35 = vpop.eup %914 }
 0x1a9   :  { %203 = vrot.lane.b32.xlu1 %v915_v35, %s1041_s3 }
 0x21b   :  { %v204_v36 = vpop.permute.xlu1 %203 }
 0x21c   :  { %v1164_v37 = vmul.f32 %v204_v36, %v188_v29 }
 0x21e   :  { %235 = vst [vmem:[#allocation1] ss:$4 sm:$0xff] %v1164_v37  ;;  %v208_v38 = vrot.slane %v1164_v37, 1  ;;  %v209_v39 = vrot.slane %v1164_v37, 2  ;;  %v210_v40 = vrot.slane %v1164_v37, 3 }
 0x220   :  { %v218_v41 = vsel %vm217_vm5, %v1164_v37, %v208_v38  ;;  %v220_v42 = vsel %vm219_vm6, %v209_v39, %v210_v40 }
 0x221   :  { %v1180_v43 = vsel %vm221_vm7, %v218_v41, %v220_v42 }
 0x225   :  { %v236_v44 = vld.sshfl [vmem:[#allocation1] sm:$0xff pattern:$0x73625140] }
 0x226   :  { %237 = vrot.lane.b32.xlu1 %v236_v44, %s1042_s24 }
 0x298   :  { %v238_v45 = vpop.permute.xlu1 %237 }
 0x299   :  { %884 = vmatmul.msk.f32.vlgmr.msra.gmra.mxu3 %vm146_vm8, %v238_v45 }
 0x29a   :  { %589 = vmatpush.msra.mxu3 %v1094_v0 }
 0x29c   :  { %590 = vmatpush.msra.mxu3 %v1099_v2 }
 0x29e   :  { %591 = vmatpush.msra.mxu3 %v1108_v5 }
 0x2a0   :  { %592 = vmatpush.msra.mxu3 %v1125_v9 }
 0x31c   :  { %v258_v47 = vpop.f32.mrf.mxu3 }
 0x31d   :  { %v261_v48 = vadd.f32 %v258_v47, %v134_v46 }
 0x31f   :  { %v885_v49 = vmul.f32 -1.442695, %v261_v48 }
 0x321   :  { %916 = vpow2.f32 %v885_v49 }
 0x327   :  { %v917_v50 = vpop.eup %916 }
 0x328   :  { %v265_v51 = vadd.f32 1.0, %v917_v50 }
 0x32a   :  { %918 = vrcp.f32 %v265_v51  ;;  %v277_v55 = vand.u32 2147483648, %v265_v51  ;;  %v275_v57 = vand.u32 2147483647, %v265_v51  ;;  %vm271_vm10 = vweird.f32 %v265_v51 }
 0x32c   :  { %v278_v59 = vor.u32 1.1754944e-38, %v277_v55  ;;  %vm276_vm12 = vcmp.eq.f32.partialorder %v275_v57, 8.507059e+37 }
 0x330   :  { %v919_v52 = vpop.eup %918 }
 0x331   :  { %v267_v53 = vmul.f32 %v919_v52, %v265_v51  ;;  %vm272_vm9 = vweird.f32 %v919_v52 }
 0x332   :  { %vm273_vm11 = vmor %vm271_vm10, %vm272_vm9 }
 0x333   :  { %v268_v54 = vsub.f32 1.0, %v267_v53  ;;  %v136_v53 = vrot.slane %v1158_v15, 6 }
 0x335   :  { %v269_v56 = vmul.f32 %v919_v52, %v268_v54 }
 0x337   :  { %v270_v58 = vadd.f32 %v919_v52, %v269_v56 }
 0x339   :  { %v274_v60 = vsel %vm273_vm11, %v919_v52, %v270_v58 }
 0x33a   :  { %v279_v61 = vsel %vm276_vm12, %v278_v59, %v274_v60 }
 0x33b   :  { %283 = vrot.lane.b32.xlu2 %v279_v61, %s1041_s3  ;;  %v281_v0 = vmul.f32 %v279_v61, %v200_v34 }
 0x395   :  { %v284_v62 = vpop.permute.xlu2 %283 }
 0x396   :  { %v286_v63 = vmul.f32 %v284_v62, %v279_v61 }
 0x398   :  { %288 = vrot.lane.b32.xlu2 %v286_v63, %s1041_s3 }
 0x3f2   :  { %v289_v1 = vpop.permute.xlu2 %288 }
 0x3f3   :  { %v291_v2 = vadd.f32 %v289_v1, %v281_v0 }
 0x3f5   :  { %920 = vtanh.f32 %v291_v2 }
 0x3fb   :  { %v921_v3 = vpop.eup %920 }
 0x3fc   :  { %294 = vrot.lane.b32.xlu0 %v921_v3, %s1041_s3 }
 0x46e   :  { %v295_v4 = vpop.permute.xlu0 %294 }
 0x46f   :  { %v1192_v5 = vmul.f32 %v295_v4, %v279_v61 }
 0x471   :  { %319 = vst [vmem:[#allocation1] ss:$4 sm:$0xff] %v1192_v5  ;;  %v299_v6 = vrot.slane %v1192_v5, 1  ;;  %v300_v7 = vrot.slane %v1192_v5, 2  ;;  %v301_v8 = vrot.slane %v1192_v5, 3 }
 0x473   :  { %v302_v9 = vsel %vm211_vm13, %v1192_v5, %v299_v6  ;;  %v303_v10 = vsel %vm213_vm14, %v300_v7, %v301_v8 }
 0x474   :  { %v1208_v11 = vsel %vm215_vm15, %v302_v9, %v303_v10 }
 0x478   :  { %v320_v13 = vld.sshfl [vmem:[#allocation1] sm:$0xff pattern:$0x73625140] }
 0x479   :  { %321 = vrot.lane.b32.xlu1 %v320_v13, %s1042_s24 }
 0x4eb   :  { %v322_v14 = vpop.permute.xlu1 %321 }
 0x4ec   :  { %886 = vmatmul.msk.f32.vlgmr.msrb.gmra.mxu3 %vm146_vm8, %v322_v14 }
 0x56f   :  { %v342_v17 = vpop.f32.mrf.mxu3 }
 0x570   :  { %v345_v18 = vadd.f32 %v342_v17, %v135_v16 }
 0x572   :  { %v887_v19 = vmul.f32 -1.442695, %v345_v18 }
 0x574   :  { %922 = vpow2.f32 %v887_v19 }
 0x57a   :  { %v923_v20 = vpop.eup %922 }
 0x57b   :  { %v349_v21 = vadd.f32 1.0, %v923_v20 }
 0x57d   :  { %924 = vrcp.f32 %v349_v21  ;;  %v361_v25 = vand.u32 2147483648, %v349_v21  ;;  %v359_v27 = vand.u32 2147483647, %v349_v21  ;;  %vm355_vm2 = vweird.f32 %v349_v21 }
 0x57f   :  { %v362_v29 = vor.u32 1.1754944e-38, %v361_v25  ;;  %vm360_vm4 = vcmp.eq.f32.partialorder %v359_v27, 8.507059e+37  ;;  %v71_v27 = vld [vmem:[%s1470_s0 + $0xa] sm:$0x3] }
 0x580   :  { %97 = vst [vmem:[#allocation1 + $0x21] ss:$4 sm:$0xff] %v71_v27 }
 0x583   :  { %v925_v22 = vpop.eup %924 }
 0x584   :  { %v351_v23 = vmul.f32 %v925_v22, %v349_v21  ;;  %vm356_vm1 = vweird.f32 %v925_v22 }
 0x585   :  { %vm357_vm3 = vmor %vm355_vm2, %vm356_vm1 }
 0x586   :  { %v352_v24 = vsub.f32 1.0, %v351_v23 }
 0x588   :  { %v353_v26 = vmul.f32 %v925_v22, %v352_v24 }
 0x58a   :  { %v354_v28 = vadd.f32 %v925_v22, %v353_v26  ;;  %v70_v26 = vld [vmem:[%s1470_s0 + $0x8] sm:$0x3] }
 0x58b   :  { %95 = vst [vmem:[#allocation1 + $0x20] ss:$4 sm:$0xff] %v70_v26 }
 0x58c   :  { %v358_v30 = vsel %vm357_vm3, %v925_v22, %v354_v28  ;;  %v72_v28 = vld [vmem:[%s1470_s0 + $0xc] sm:$0x3] }
 0x58d   :  { %v363_v31 = vsel %vm360_vm4, %v362_v29, %v358_v30  ;;  %v73_v29 = vld [vmem:[%s1470_s0 + $0xe] sm:$0x3]  ;;  %99 = vst [vmem:[#allocation1 + $0x22] ss:$4 sm:$0xff] %v72_v28 }
 0x58e   :  { %367 = vrot.lane.b32.xlu2 %v363_v31, %s1041_s3  ;;  %v365_v34 = vmul.f32 %v363_v31, %v291_v2  ;;  %101 = vst [vmem:[#allocation1 + $0x23] ss:$4 sm:$0xff] %v73_v29 }
 0x595   :  { %v103_v30 = vld.sshfl [vmem:[#allocation1 + $0x20] sm:$0xff pattern:$0x73625140] }
 0x596   :  { %882 = vmatmul.msk.f32.gmra.mxu0 %vm104_vm0, %v103_v30 }
 0x5e8   :  { %v368_v32 = vpop.permute.xlu2 %367 }
 0x5e9   :  { %v370_v33 = vmul.f32 %v368_v32, %v363_v31 }
 0x5eb   :  { %372 = vrot.lane.b32.xlu0 %v370_v33, %s1041_s3 }
 0x613   :  { %v129_v32 = vpop.f32.mrf.mxu0 }
 0x614   :  { %v1274_v33 = vadd.f32 %v1155_v12, %v129_v32 }
 0x65d   :  { %v373_v35 = vpop.permute.xlu0 %372 }
 0x65e   :  { %v375_v36 = vadd.f32 %v373_v35, %v365_v34 }
 0x660   :  { %926 = vtanh.f32 %v375_v36 }
 0x666   :  { %v927_v41 = vpop.eup %926 }
 0x667   :  { %378 = vrot.lane.b32.xlu1 %v927_v41, %s1041_s3 }
 0x6d9   :  { %v379_v42 = vpop.permute.xlu1 %378 }
 0x6da   :  { %v1216_v44 = vmul.f32 %v379_v42, %v363_v31 }
 0x6dc   :  { %403 = vst [vmem:[#allocation1] ss:$4 sm:$0xff] %v1216_v44  ;;  %v383_v45 = vrot.slane %v1216_v44, 1  ;;  %v384_v46 = vrot.slane %v1216_v44, 2  ;;  %v385_v47 = vrot.slane %v1216_v44, 3 }
 0x6de   :  { %v386_v48 = vsel %vm211_vm13, %v1216_v44, %v383_v45  ;;  %v387_v49 = vsel %vm213_vm14, %v384_v46, %v385_v47 }
 0x6df   :  { %v1232_v50 = vsel %vm215_vm15, %v386_v48, %v387_v49 }
 0x6e3   :  { %v404_v51 = vld.sshfl [vmem:[#allocation1] sm:$0xff pattern:$0x73625140] }
 0x6e4   :  { %405 = vrot.lane.b32.xlu2 %v404_v51, %s1042_s24 }
 0x73e   :  { %v406_v52 = vpop.permute.xlu2 %405 }
 0x73f   :  { %888 = vmatmul.msk.f32.vlgmr.msrb.gmra.mxu1 %vm146_vm8, %v406_v52 }
 0x7bc   :  { %v426_v54 = vpop.f32.mrf.mxu1 }
 0x7bd   :  { %v429_v55 = vadd.f32 %v426_v54, %v136_v53 }
 0x7bf   :  { %v889_v56 = vmul.f32 -1.442695, %v429_v55 }
 0x7c1   :  { %928 = vpow2.f32 %v889_v56 }
 0x7c7   :  { %v929_v57 = vpop.eup %928 }
 0x7c8   :  { %v433_v58 = vadd.f32 1.0, %v929_v57 }
 0x7ca   :  { %930 = vrcp.f32 %v433_v58  ;;  %v445_v62 = vand.u32 2147483648, %v433_v58  ;;  %v443_v0 = vand.u32 2147483647, %v433_v58  ;;  %vm439_vm10 = vweird.f32 %v433_v58 }
 0x7cc   :  { %v446_v2 = vor.u32 1.1754944e-38, %v445_v62  ;;  %vm444_vm12 = vcmp.eq.f32.partialorder %v443_v0, 8.507059e+37 }
 0x7d0   :  { %v931_v59 = vpop.eup %930 }
 0x7d1   :  { %v435_v60 = vmul.f32 %v931_v59, %v433_v58  ;;  %vm440_vm9 = vweird.f32 %v931_v59 }
 0x7d2   :  { %vm441_vm11 = vmor %vm439_vm10, %vm440_vm9 }
 0x7d3   :  { %v436_v61 = vsub.f32 1.0, %v435_v60 }
 0x7d5   :  { %v437_v63 = vmul.f32 %v931_v59, %v436_v61 }
 0x7d7   :  { %v438_v1 = vadd.f32 %v931_v59, %v437_v63 }
 0x7d9   :  { %v442_v3 = vsel %vm441_vm11, %v931_v59, %v438_v1 }
 0x7da   :  { %v447_v15 = vsel %vm444_vm12, %v446_v2, %v442_v3 }
 0x7db   :  { %451 = vrot.lane.b32.xlu0 %v447_v15, %s1041_s3  ;;  %v449_v10 = vmul.f32 %v447_v15, %v375_v36 }
 0x84d   :  { %v452_v4 = vpop.permute.xlu0 %451 }
 0x84e   :  { %v454_v9 = vmul.f32 %v452_v4, %v447_v15 }
 0x850   :  { %456 = vrot.lane.b32.xlu1 %v454_v9, %s1041_s3 }
 0x8c2   :  { %v457_v13 = vpop.permute.xlu1 %456 }
 0x8c3   :  { %v459_v14 = vadd.f32 %v457_v13, %v449_v10 }
 0x8c5   :  { %932 = vtanh.f32 %v459_v14 }
 0x8cb   :  { %v933_v16 = vpop.eup %932 }
 0x8cc   :  { %462 = vrot.lane.b32.xlu2 %v933_v16, %s1041_s3  ;;  %v137_v16 = vrot.slane %v1274_v33, 2 }
 0x926   :  { %v463_v17 = vpop.permute.xlu2 %462 }
 0x927   :  { %v1240_v18 = vmul.f32 %v463_v17, %v447_v15 }
 0x929   :  { %487 = vst [vmem:[#allocation1] ss:$4 sm:$0xff] %v1240_v18  ;;  %v467_v19 = vrot.slane %v1240_v18, 1  ;;  %v468_v20 = vrot.slane %v1240_v18, 2  ;;  %v469_v21 = vrot.slane %v1240_v18, 3 }
 0x92b   :  { %v473_v22 = vsel %vm217_vm5, %v1240_v18, %v467_v19  ;;  %v474_v23 = vsel %vm219_vm6, %v468_v20, %v469_v21 }
 0x92c   :  { %v1256_v24 = vsel %vm221_vm7, %v473_v22, %v474_v23 }
 0x930   :  { %v488_v25 = vld.sshfl [vmem:[#allocation1] sm:$0xff pattern:$0x73625140] }
 0x931   :  { %489 = vrot.lane.b32.xlu0 %v488_v25, %s1042_s24 }
 0x9a3   :  { %v490_v31 = vpop.permute.xlu0 %489 }
 0x9a4   :  { %890 = vmatmul.msk.f32.vlgmr.msra.gmra.mxu2 %vm146_vm8, %v490_v31 }
 0xa27   :  { %v510_v34 = vpop.f32.mrf.mxu2 }
 0xa28   :  { %v513_v35 = vadd.f32 %v510_v34, %v1274_v33 }
 0xa2a   :  { %v891_v36 = vmul.f32 -1.442695, %v513_v35 }
 0xa2c   :  { %934 = vpow2.f32 %v891_v36 }
 0xa32   :  { %v935_v41 = vpop.eup %934 }
 0xa33   :  { %v517_v42 = vadd.f32 1.0, %v935_v41 }
 0xa35   :  { %936 = vrcp.f32 %v517_v42  ;;  %v529_v52 = vand.u32 2147483648, %v517_v42  ;;  %v527_v54 = vand.u32 2147483647, %v517_v42  ;;  %vm523_vm1 = vweird.f32 %v517_v42 }
 0xa37   :  { %v530_v12 = vor.u32 1.1754944e-38, %v529_v52  ;;  %vm528_vm3 = vcmp.eq.f32.partialorder %v527_v54, 8.507059e+37 }
 0xa3b   :  { %v937_v48 = vpop.eup %936 }
 0xa3c   :  { %v519_v49 = vmul.f32 %v937_v48, %v517_v42  ;;  %vm524_vm0 = vweird.f32 %v937_v48 }
 0xa3d   :  { %vm525_vm2 = vmor %vm523_vm1, %vm524_vm0 }
 0xa3e   :  { %v520_v51 = vsub.f32 1.0, %v519_v49 }
 0xa40   :  { %v521_v53 = vmul.f32 %v937_v48, %v520_v51 }
 0xa42   :  { %v522_v55 = vadd.f32 %v937_v48, %v521_v53 }
 0xa44   :  { %v526_v56 = vsel %vm525_vm2, %v937_v48, %v522_v55 }
 0xa45   :  { %v531_v57 = vsel %vm528_vm3, %v530_v12, %v526_v56 }
 0xa46   :  { %535 = vrot.lane.b32.xlu1 %v531_v57, %s1041_s3  ;;  %v533_v60 = vmul.f32 %v531_v57, %v459_v14 }
 0xab8   :  { %v536_v58 = vpop.permute.xlu1 %535 }
 0xab9   :  { %v538_v59 = vmul.f32 %v536_v58, %v531_v57 }
 0xabb   :  { %540 = vrot.lane.b32.xlu2 %v538_v59, %s1041_s3 }
 0xb15   :  { %v541_v61 = vpop.permute.xlu2 %540 }
 0xb16   :  { %v543_v62 = vadd.f32 %v541_v61, %v533_v60 }
 0xb18   :  { %938 = vtanh.f32 %v543_v62 }
 0xb1e   :  { %v939_v63 = vpop.eup %938 }
 0xb1f   :  { %546 = vrot.lane.b32.xlu0 %v939_v63, %s1041_s3  ;;  %v138_v63 = vrot.slane %v1274_v33, 4 }
 0xb91   :  { %v547_v0 = vpop.permute.xlu0 %546 }
 0xb92   :  { %v1280_v1 = vmul.f32 %v547_v0, %v531_v57 }
 0xb94   :  { %571 = vst [vmem:[#allocation1] ss:$4 sm:$0xff] %v1280_v1  ;;  %v551_v2 = vrot.slane %v1280_v1, 1  ;;  %v552_v3 = vrot.slane %v1280_v1, 2  ;;  %v553_v15 = vrot.slane %v1280_v1, 3 }
 0xb96   :  { %v554_v4 = vsel %vm211_vm13, %v1280_v1, %v551_v2  ;;  %v555_v9 = vsel %vm213_vm14, %v552_v3, %v553_v15 }
 0xb97   :  { %v1296_v10 = vsel %vm215_vm15, %v554_v4, %v555_v9 }
 0xb9b   :  { %v572_v13 = vld.sshfl [vmem:[#allocation1] sm:$0xff pattern:$0x73625140] }
 0xb9c   :  { %573 = vrot.lane.b32.xlu1 %v572_v13, %s1042_s24 }
 0xc0e   :  { %v574_v14 = vpop.permute.xlu1 %573 }
 0xc0f   :  { %892 = vmatmul.msk.f32.vlgmr.msra.gmra.mxu3 %vm146_vm8, %v574_v14 }
 0xc92   :  { %v594_v17 = vpop.f32.mrf.mxu3 }
 0xc93   :  { %v597_v22 = vadd.f32 %v594_v17, %v137_v16 }
 0xc95   :  { %v893_v23 = vmul.f32 -1.442695, %v597_v22 }
 0xc97   :  { %940 = vpow2.f32 %v893_v23 }
 0xc9d   :  { %v941_v25 = vpop.eup %940 }
 0xc9e   :  { %v601_v26 = vadd.f32 1.0, %v941_v25 }
 0xca0   :  { %942 = vrcp.f32 %v601_v26  ;;  %v613_v30 = vand.u32 2147483648, %v601_v26  ;;  %v611_v32 = vand.u32 2147483647, %v601_v26  ;;  %vm607_vm9 = vweird.f32 %v601_v26 }
 0xca2   :  { %v614_v35 = vor.u32 1.1754944e-38, %v613_v30  ;;  %vm612_vm11 = vcmp.eq.f32.partialorder %v611_v32, 8.507059e+37 }
 0xca6   :  { %v943_v27 = vpop.eup %942 }
 0xca7   :  { %v603_v28 = vmul.f32 %v943_v27, %v601_v26  ;;  %vm608_vm4 = vweird.f32 %v943_v27 }
 0xca8   :  { %vm609_vm10 = vmor %vm607_vm9, %vm608_vm4 }
 0xca9   :  { %v604_v29 = vsub.f32 1.0, %v603_v28 }
 0xcab   :  { %v605_v31 = vmul.f32 %v943_v27, %v604_v29 }
 0xcad   :  { %v606_v34 = vadd.f32 %v943_v27, %v605_v31 }
 0xcaf   :  { %v610_v36 = vsel %vm609_vm10, %v943_v27, %v606_v34 }
 0xcb0   :  { %v615_v41 = vsel %vm612_vm11, %v614_v35, %v610_v36  ;;  %vm232_vm11 = vcmask 253952  }
 0xcb1   :  { %619 = vrot.lane.b32.xlu2 %v615_v41, %s1041_s3  ;;  %v617_v49 = vmul.f32 %v615_v41, %v543_v62 }
 0xd0b   :  { %v620_v42 = vpop.permute.xlu2 %619 }
 0xd0c   :  { %v622_v48 = vmul.f32 %v620_v42, %v615_v41 }
 0xd0e   :  { %624 = vrot.lane.b32.xlu0 %v622_v48, %s1041_s3 }
 0xd80   :  { %v625_v51 = vpop.permute.xlu0 %624 }
 0xd81   :  { %v627_v52 = vadd.f32 %v625_v51, %v617_v49 }
 0xd83   :  { %944 = vtanh.f32 %v627_v52 }
 0xd89   :  { %v945_v53 = vpop.eup %944 }
 0xd8a   :  { %630 = vrot.lane.b32.xlu1 %v945_v53, %s1041_s3 }
 0xdfc   :  { %v631_v54 = vpop.permute.xlu1 %630 }
 0xdfd   :  { %v1304_v55 = vmul.f32 %v631_v54, %v615_v41 }
 0xdff   :  { %655 = vst [vmem:[#allocation1] ss:$4 sm:$0xff] %v1304_v55  ;;  %v635_v12 = vrot.slane %v1304_v55, 1  ;;  %v636_v56 = vrot.slane %v1304_v55, 2  ;;  %v637_v57 = vrot.slane %v1304_v55, 3 }
 0xe01   :  { %v641_v58 = vsel %vm217_vm5, %v1304_v55, %v635_v12  ;;  %v642_v59 = vsel %vm219_vm6, %v636_v56, %v637_v57 }
 0xe02   :  { %v1320_v60 = vsel %vm221_vm7, %v641_v58, %v642_v59 }
 0xe06   :  { %v656_v61 = vld.sshfl [vmem:[#allocation1] sm:$0xff pattern:$0x73625140] }
 0xe07   :  { %657 = vrot.lane.b32.xlu2 %v656_v61, %s1042_s24 }
 0xe61   :  { %v658_v62 = vpop.permute.xlu2 %657 }
 0xe62   :  { %894 = vmatmul.msk.f32.vlgmr.msrb.gmra.mxu0 %vm146_vm8, %v658_v62  ;;  %v139_v62 = vrot.slane %v1274_v33, 6 }
 0xedf   :  { %v678_v0 = vpop.f32.mrf.mxu0 }
 0xee0   :  { %v681_v4 = vadd.f32 %v678_v0, %v138_v63 }
 0xee2   :  { %v895_v9 = vmul.f32 -1.442695, %v681_v4 }
 0xee4   :  { %946 = vpow2.f32 %v895_v9 }
 0xeea   :  { %v947_v13 = vpop.eup %946 }
 0xeeb   :  { %v685_v14 = vadd.f32 1.0, %v947_v13 }
 0xeed   :  { %948 = vrcp.f32 %v685_v14  ;;  %v697_v23 = vand.u32 2147483648, %v685_v14  ;;  %v695_v26 = vand.u32 2147483647, %v685_v14  ;;  %vm691_vm0 = vweird.f32 %v685_v14 }
 0xeef   :  { %v698_v28 = vor.u32 1.1754944e-38, %v697_v23  ;;  %vm696_vm2 = vcmp.eq.f32.partialorder %v695_v26, 8.507059e+37 }
 0xef3   :  { %v949_v16 = vpop.eup %948 }
 0xef4   :  { %v687_v17 = vmul.f32 %v949_v16, %v685_v14  ;;  %vm692_vm12 = vweird.f32 %v949_v16 }
 0xef5   :  { %vm693_vm1 = vmor %vm691_vm0, %vm692_vm12 }
 0xef6   :  { %v688_v22 = vsub.f32 1.0, %v687_v17 }
 0xef8   :  { %v689_v25 = vmul.f32 %v949_v16, %v688_v22 }
 0xefa   :  { %v690_v27 = vadd.f32 %v949_v16, %v689_v25 }
 0xefc   :  { %v694_v29 = vsel %vm693_vm1, %v949_v16, %v690_v27 }
 0xefd   :  { %v699_v30 = vsel %vm696_vm2, %v698_v28, %v694_v29  ;;  %v212_v29 = vsel %vm211_vm13, %v1164_v37, %v208_v38  ;;  %v471_v38 = vsel %vm213_vm14, %v468_v20, %v469_v21 }
 0xefe   :  { %703 = vrot.lane.b32.xlu0 %v699_v30, %s1041_s3  ;;  %v701_v34 = vmul.f32 %v699_v30, %v627_v52 }
 0xf70   :  { %v704_v31 = vpop.permute.xlu0 %703 }
 0xf71   :  { %v706_v32 = vmul.f32 %v704_v31, %v699_v30 }
 0xf73   :  { %708 = vrot.lane.b32.xlu1 %v706_v32, %s1041_s3 }
 0xfe5   :  { %v709_v35 = vpop.permute.xlu1 %708 }
 0xfe6   :  { %v1327_v36 = vadd.f32 %v709_v35, %v701_v34  ;;  %v470_v34 = vsel %vm211_vm13, %v1240_v18, %v467_v19  ;;  %v305_v19 = vsel %vm217_vm5, %v1192_v5, %v299_v6  ;;  %v306_v18 = vsel %vm219_vm6, %v300_v7, %v301_v8 }
 0xfe7   :  { %v472_v37 = vsel %vm215_vm15, %v470_v34, %v471_v38  ;;  %v307_v21 = vsel %vm221_vm7, %v305_v19, %v306_v18  ;;  %v558_v6 = vsel %vm219_vm6, %v552_v3, %v553_v15  ;;  %v389_v3 = vsel %vm217_vm5, %v1216_v44, %v383_v45  ;;  %v63_v18 = vld [vmem:[#allocation6 + $0x18] sm:$0xff] }
 0xfe8   :  { %950 = vtanh.f32 %v1327_v36  ;;  %v477_v35 = vperm.slane %v472_v37, 0  ;;  %v390_v15 = vsel %vm219_vm6, %v384_v46, %v385_v47  ;;  %v644_v37 = vrot.slane %v1320_v60, 1  ;;  %846 = vmatpush.msrb.mxu2 %v63_v18  ;;  %v60_v60 = vld [vmem:[#allocation6] sm:$0xff] }
 0xfee   :  { %v951_v41 = vpop.eup %950 }
 0xfef   :  { %714 = vrot.lane.b32.xlu2 %v951_v41, %s1041_s3 }
0x1049   :  { %v715_v42 = vpop.permute.xlu2 %714 }
0x104a   :  { %v717_v48 = vmul.f32 %v715_v42, %v699_v30  ;;  %v214_v30 = vsel %vm213_vm14, %v209_v39, %v210_v40  ;;  %v308_v42 = vrot.slane %v307_v21, 1  ;;  %v61_v21 = vld [vmem:[#allocation6 + $0x8] sm:$0xff] }
0x104b   :  { %v216_v31 = vsel %vm215_vm15, %v212_v29, %v214_v30 }
0x104c   :  { %739 = vst [vmem:[#allocation1] ss:$4 sm:$0xff] %v717_v48  ;;  %v719_v49 = vrot.slane %v717_v48, 1  ;;  %v720_v51 = vrot.slane %v717_v48, 2  ;;  %v721_v53 = vrot.slane %v717_v48, 3  ;;  %v224_v32 = vperm.slane %v216_v31, 0 }
0x104d   :  { %v310_v5 = vperm.slane %v308_v42, 0 }
0x104e   :  { %v725_v54 = vsel %vm217_vm5, %v717_v48, %v719_v49  ;;  %v726_v58 = vsel %vm219_vm6, %v720_v51, %v721_v53  ;;  %v722_v39 = vsel %vm211_vm13, %v717_v48, %v719_v49  ;;  %v723_v40 = vsel %vm213_vm14, %v720_v51, %v721_v53 }
0x104f   :  { %v1334_v52 = vsel %vm221_vm7, %v725_v54, %v726_v58  ;;  %v724_v41 = vsel %vm215_vm15, %v722_v39, %v723_v40  ;;  %v557_v48 = vsel %vm217_vm5, %v1280_v1, %v551_v2  ;;  %v309_v1 = vperm.slane %v1208_v11, 0 }
0x1050   :  { %v729_v20 = vperm.slane %v724_v41, 0  ;;  %v559_v7 = vsel %vm221_vm7, %v557_v48, %v558_v6  ;;  %v561_v58 = vperm.slane %v1296_v10, 0  ;;  %v391_v11 = vsel %vm221_vm7, %v389_v3, %v390_v15 }
0x1051   :  { %v560_v8 = vrot.slane %v559_v7, 1 }
0x1053   :  { %v740_v59 = vld.sshfl [vmem:[#allocation1] sm:$0xff pattern:$0x73625140]  ;;  %v562_v49 = vperm.slane %v560_v8, 0 }
0x1054   :  { %741 = vrot.lane.b32.xlu0 %v740_v59, %s1042_s24  ;;  %v392_v59 = vrot.slane %v391_v11, 1  ;;  %v909_v8 = vld [vmem:[%s1475_s5] ss:$0 sm:$0xff] }
0x1056   :  { %v394_v45 = vperm.slane %v392_v59, 0 }
0x10c6   :  { %v742_v61 = vpop.permute.xlu0 %741 }
0x10c7   :  { %896 = vmatmul.msk.f32.vlgmr.msra.gmra.mxu1 %vm146_vm8, %v742_v61 }
0x1144   :  { %v762_v63 = vpop.f32.mrf.mxu1 }
0x1145   :  { %v765_v0 = vadd.f32 %v762_v63, %v139_v62 }
0x1147   :  { %v897_v4 = vmul.f32 -1.442695, %v765_v0 }
0x1149   :  { %952 = vpow2.f32 %v897_v4 }
0x114f   :  { %v953_v9 = vpop.eup %952 }
0x1150   :  { %v769_v13 = vadd.f32 1.0, %v953_v9  ;;  %v393_v9 = vperm.slane %v1232_v50, 0  ;;  %v223_v50 = vrot.slane %v1180_v43, 1 }
0x1152   :  { %954 = vrcp.f32 %v769_v13  ;;  %v781_v22 = vand.u32 2147483648, %v769_v13  ;;  %v779_v25 = vand.u32 2147483647, %v769_v13  ;;  %vm775_vm4 = vweird.f32 %v769_v13 }
0x1154   :  { %v782_v27 = vor.u32 1.1754944e-38, %v781_v22  ;;  %vm780_vm10 = vcmp.eq.f32.partialorder %v779_v25, 8.507059e+37  ;;  %v225_v22 = vperm.slane %v223_v50, 0 }
0x1158   :  { %v955_v14 = vpop.eup %954 }
0x1159   :  { %v771_v16 = vmul.f32 %v955_v14, %v769_v13  ;;  %vm776_vm3 = vweird.f32 %v955_v14  ;;  %v639_v13 = vsel %vm213_vm14, %v636_v56, %v637_v57 }
0x115a   :  { %vm777_vm9 = vmor %vm775_vm4, %vm776_vm3 }
0x115b   :  { %v772_v17 = vsub.f32 1.0, %v771_v16 }
0x115d   :  { %v773_v23 = vmul.f32 %v955_v14, %v772_v17 }
0x115f   :  { %v774_v26 = vadd.f32 %v955_v14, %v773_v23 }
0x1161   :  { %v778_v28 = vsel %vm777_vm9, %v955_v14, %v774_v26 }
0x1162   :  { %v1339_v33 = vsel %vm780_vm10, %v782_v27, %v778_v28 }
0x1163   :  { %787 = vrot.lane.b32.xlu1 %v1339_v33, %s1041_s3  ;;  %v785_v46 = vmul.f32 %v1339_v33, %v1327_v36  ;;  %v638_v36 = vsel %vm211_vm13, %v1304_v55, %v635_v12  ;;  %v476_v12 = vrot.slane %v1256_v24, 1  ;;  %v728_v55 = vrot.slane %v1334_v52, 1 }
0x1164   :  { %v640_v14 = vsel %vm215_vm15, %v638_v36, %v639_v13 }
0x1165   :  { %v645_v17 = vperm.slane %v640_v14, 0  ;;  %v478_v23 = vperm.slane %v476_v12, 0  ;;  %v730_v56 = vperm.slane %v728_v55, 0 }
0x116b   :  { %226 = vrot.lane.b32.xlu1 %v224_v32, %s1042_s24 }
0x1173   :  { %479 = vrot.lane.b32.xlu1 %v477_v35, %s1042_s24  ;;  %v646_v35 = vperm.slane %v644_v37, 0 }
0x117b   :  { %731 = vrot.lane.b32.xlu1 %v729_v20, %s1042_s24  ;;  %v62_v20 = vld [vmem:[#allocation6 + $0x10] sm:$0xff] }
0x117c   :  { %847 = vmatpush.msrb.mxu2 %v62_v20 }
0x117e   :  { %848 = vmatpush.msrb.mxu2 %v61_v21 }
0x1180   :  { %849 = vmatpush.msrb.mxu2 %v60_v60 }
0x1183   :  { %313 = vrot.lane.b32.xlu1 %v310_v5, %s1042_s24 }
0x118b   :  { %565 = vrot.lane.b32.xlu1 %v562_v49, %s1042_s24 }
0x11d5   :  { %v788_v51 = vpop.permute.xlu1 %787 }
0x11d6   :  { %v790_v53 = vmul.f32 %v788_v51, %v1339_v33 }
0x11d8   :  { %792 = vrot.lane.b32.xlu2 %v790_v53, %s1041_s3 }
0x11dd   :  { %v227_v2 = vpop.permute.xlu1 %226 }
0x11de   :  { %233 = vst.msk [vmem:[#allocation2] sm:$0x1] %vm232_vm11, %v227_v2 }
0x11e0   :  { %311 = vrot.lane.b32.xlu2 %v309_v1, %s1042_s24 }
0x11e5   :  { %v480_v54 = vpop.permute.xlu1 %479 }
0x11e6   :  { %485 = vst.msk [vmem:[#allocation2 + $0x3] sm:$0x1] %vm232_vm11, %v480_v54 }
0x11e8   :  { %563 = vrot.lane.b32.xlu2 %v561_v58, %s1042_s24 }
0x11ed   :  { %v732_v61 = vpop.permute.xlu1 %731 }
0x11ee   :  { %737 = vst.msk [vmem:[#allocation2 + $0x6] sm:$0x1] %vm232_vm11, %v732_v61 }
0x11f0   :  { %397 = vrot.lane.b32.xlu2 %v394_v45, %s1042_s24 }
0x11f5   :  { %v314_v62 = vpop.permute.xlu1 %313 }
0x11f6   :  { %318 = vst.msk [vmem:[#allocation2 + $0x9] sm:$0x1] %vm232_vm11, %v314_v62 }
0x11fd   :  { %v566_v44 = vpop.permute.xlu1 %565 }
0x11fe   :  { %570 = vst.msk [vmem:[#allocation2 + $0xc] sm:$0x1] %vm232_vm11, %v566_v44 }
0x1232   :  { %v793_v47 = vpop.permute.xlu2 %792 }
0x1233   :  { %v795_v10 = vadd.f32 %v793_v47, %v785_v46 }
0x1235   :  { %956 = vtanh.f32 %v795_v10 }
0x123a   :  { %v312_v63 = vpop.permute.xlu2 %311 }
0x123b   :  { %v957_v0 = vpop.eup %956  ;;  %317 = vst.msk [vmem:[#allocation2 + $0x1] sm:$0x1] %vm232_vm11, %v312_v63 }
0x123c   :  { %798 = vrot.lane.b32.xlu0 %v957_v0, %s1041_s3 }
0x1242   :  { %v564_v4 = vpop.permute.xlu2 %563 }
0x1243   :  { %569 = vst.msk [vmem:[#allocation2 + $0x4] sm:$0x1] %vm232_vm11, %v564_v4 }
0x1244   :  { %395 = vrot.lane.b32.xlu0 %v393_v9, %s1042_s24 }
0x124a   :  { %v398_v16 = vpop.permute.xlu2 %397 }
0x124b   :  { %402 = vst.msk [vmem:[#allocation2 + $0xa] sm:$0x1] %vm232_vm11, %v398_v16 }
0x124c   :  { %647 = vrot.lane.b32.xlu0 %v645_v17, %s1042_s24 }
0x1254   :  { %228 = vrot.lane.b32.xlu0 %v225_v22, %s1042_s24 }
0x125c   :  { %481 = vrot.lane.b32.xlu0 %v478_v23, %s1042_s24 }
0x1264   :  { %733 = vrot.lane.b32.xlu0 %v730_v56, %s1042_s24 }
0x12ae   :  { %v799_v57 = vpop.permute.xlu0 %798 }
0x12af   :  { %v801_v25 = vmul.f32 %v799_v57, %v1339_v33 }
0x12b1   :  { %v803_v26 = vrot.slane %v801_v25, 1  ;;  %v804_v27 = vrot.slane %v801_v25, 2  ;;  %v805_v28 = vrot.slane %v801_v25, 3 }
0x12b3   :  { %v806_v43 = vsel %vm211_vm13, %v801_v25, %v803_v26  ;;  %v807_v29 = vsel %vm213_vm14, %v804_v27, %v805_v28  ;;  %v809_v24 = vsel %vm217_vm5, %v801_v25, %v803_v26  ;;  %v810_v30 = vsel %vm219_vm6, %v804_v27, %v805_v28 }
0x12b4   :  { %v808_v31 = vsel %vm215_vm15, %v806_v43, %v807_v29  ;;  %v811_v52 = vsel %vm221_vm7, %v809_v24, %v810_v30 }
0x12b5   :  { %v813_v32 = vperm.slane %v808_v31, 0  ;;  %v812_v34 = vrot.slane %v811_v52, 1 }
0x12b6   :  { %v396_v38 = vpop.permute.xlu0 %395 }
0x12b7   :  { %401 = vst.msk [vmem:[#allocation2 + $0x2] sm:$0x1] %vm232_vm11, %v396_v38  ;;  %815 = vrot.lane.b32.xlu2 %v813_v32, %s1042_s24  ;;  %v814_v33 = vperm.slane %v812_v34, 0 }
0x12b9   :  { %817 = vrot.lane.b32.xlu1 %v814_v33, %s1042_s24 }
0x12be   :  { %v648_v39 = vpop.permute.xlu0 %647 }
0x12bf   :  { %653 = vst.msk [vmem:[#allocation2 + $0x5] sm:$0x1] %vm232_vm11, %v648_v39  ;;  %649 = vrot.lane.b32.xlu2 %v646_v35, %s1042_s24 }
0x12c6   :  { %v229_v40 = vpop.permute.xlu0 %228 }
0x12c7   :  { %234 = vst.msk [vmem:[#allocation2 + $0x8] sm:$0x1] %vm232_vm11, %v229_v40 }
0x12ce   :  { %v482_v41 = vpop.permute.xlu0 %481 }
0x12cf   :  { %486 = vst.msk [vmem:[#allocation2 + $0xb] sm:$0x1] %vm232_vm11, %v482_v41 }
0x12d6   :  { %v734_v19 = vpop.permute.xlu0 %733 }
0x12d7   :  { %738 = vst.msk [vmem:[#allocation2 + $0xe] sm:$0x1] %vm232_vm11, %v734_v19 }
0x1311   :  { %v816_v42 = vpop.permute.xlu2 %815 }
0x1312   :  { %821 = vst.msk [vmem:[#allocation2 + $0x7] sm:$0x1] %vm232_vm11, %v816_v42 }
0x1319   :  { %v650_v48 = vpop.permute.xlu2 %649  ;;  %v823_v6 = vld [vmem:[#allocation2] sm:$0xff] }
0x131a   :  { %654 = vst.msk [vmem:[#allocation2 + $0xd] sm:$0x1] %vm232_vm11, %v650_v48  ;;  %898 = vmatmul.msk.f32.vlgmr.msrb.gmra.mxu2 %vm146_vm8, %v823_v6 }
0x132b   :  { %v818_v5 = vpop.permute.xlu1 %817 }
0x132c   :  { %822 = vst.msk [vmem:[#allocation2 + $0xf] sm:$0x1] %vm232_vm11, %v818_v5 }
0x1333   :  { %v824_v7 = vld [vmem:[#allocation2 + $0x8] sm:$0xff] }
0x1334   :  { %899 = vmatmul.msk.f32.gmra.mxu2 %vm146_vm8, %v824_v7 }
0x139d   :  { %v851_v49 = vpop.f32.mrf.mxu2 }
0x139e   :  { %v852_v51 = vadd.f32 %v909_v8, %v851_v49 }
0x13a0   :  { %v857_v53 = vmax.f32 %v852_v51, 0.0 }
0x13a2   :  { %859 = vst.msk [vmem:[#allocation8] sm:$0xff] %vm146_vm8, %v857_v53 }
0x13b7   :  { %v854_v2 = vpop.f32.mrf.mxu2 }
0x13b8   :  { %v855_v1 = vadd.f32 %v909_v8, %v854_v2 }
0x13ba   :  { %v858_v3 = vmax.f32 %v855_v1, 0.0 }
0x13bc   :  { %860 = vst.msk [vmem:[#allocation8 + $0x8] sm:$0xff] %vm146_vm8, %v858_v3 }
0x13bd   :  { %873 = dma.vmem_to_hbm [thread:$0]  %s866_s11, 256, %s868_s14, [#allocation5], %s1037_s29, %s1037_s29, %s1038_s30  }
0x13be   :  { %1034 = dma.done.wait [#allocation5], 256  }
0x13bf   :  { %1035 = vsyncadd [#allocation5], 4294967040 }
0x13c0   :  { %878 = vsyncpa [#allocation4], 1 }
0x13c1   :  { %879 = vsyncpa [#allocation7], 1 }
0x13c2   :  { %880 = vsyncpa [#allocation5], 1 }

</bundles_post_ra>
